<compile_context>
chip_gen: v7x
topology: tpu7x:2x2x1
jax: 0.10.0
libtpu: 0.0.40
codegen_flags: <defaults>
</compile_context>

<pallas_src>
import functools

import numpy as np
import jax
import jax.numpy as jnp
from jax.experimental import pallas as pl
from jax.experimental.pallas import tpu as pltpu

S = 7
B = 2
C = 2
N_CH = B * 5 + C          # 12 channels per cell
LAMBDA_COORD = 5.0
LAMBDA_NOOBJ = 0.1

# rows per tile (multiple of 8). 512 rows -> 12ch * 512 * 128 * 4B = 3.1 MiB
# per input per buffer; ~12.6 MiB double-buffered for both inputs.
TILE_ROWS_MAX = 512


# ----------------------------- Pallas kernel ------------------------------ #

def yolo_v1_loss_kernel(pred_ref, label_ref, out_ref, acc_ref, *,
                        pad_cells, inv_batch):
    """One grid step over a [12, tr, 128] channel-major tile of cells.

    acc_ref : VMEM (3, tr, 128) f32 accumulator, persistent across the grid:
        [0] object term  (conf + lambda_coord*coord + cls squared errors)
        [1] no-object confidence squared error
        [2] no-object cell indicator (padded cells included, corrected later)
    """
    g = pl.program_id(0)

    @pl.when(g == 0)
    def _init():
        acc_ref[...] = jnp.zeros_like(acc_ref)

    inv_s = jnp.float32(1.0 / S)        # fold '/ S' into a multiply

    # channel-plane loads, deduplicated at trace time
    _pc, _lc = {}, {}

    def P(k):
        if k not in _pc:
            _pc[k] = pred_ref[k].astype(jnp.float32)    # [tr, 128]
        return _pc[k]

    def L(k):
        if k not in _lc:
            _lc[k] = label_ref[k].astype(jnp.float32)
        return _lc[k]

    l_conf = L(4)
    obj = l_conf > 0.0
    noobj = l_conf == 0.0

    # --- no-object confidence squared error (conf channels of both boxes) ---
    d4 = P(4) - l_conf
    d9 = P(9) - L(9)
    noobj_sq = jnp.where(noobj, d4 * d4 + d9 * d9, 0.0)

    # --- class squared error (consumed only on object cells) ---
    cls_sq = jnp.zeros_like(l_conf)
    for c in range(C):
        dc = P(5 * B + c) - L(5 * B + c)
        cls_sq = cls_sq + dc * dc

    # --- responsible-box selection: IoU of both pred boxes vs label box 0 ---
    def xyxy(get, off):
        cx = get(off + 0) * inv_s
        cy = get(off + 1) * inv_s
        w = get(off + 2)
        h = get(off + 3)
        return cx - 0.5 * w, cy - 0.5 * h, cx + 0.5 * w, cy + 0.5 * h

    def inter_union(a, b):
        ax1, ay1, ax2, ay2 = a
        bx1, by1, bx2, by2 = b
        iw = jnp.maximum(jnp.minimum(ax2, bx2) - jnp.maximum(ax1, bx1), 0.0)
        ih = jnp.maximum(jnp.minimum(ay2, by2) - jnp.maximum(ay1, by1), 0.0)
        inter = iw * ih
        union = (ax2 - ax1) * (ay2 - ay1) + (bx2 - bx1) * (by2 - by1) - inter
        return inter, union

    lbox = xyxy(L, 0)
    inter0, union0 = inter_union(xyxy(P, 0), lbox)
    inter1, union1 = inter_union(xyxy(P, 5), lbox)

    # division-free argmax (ties -> box 0), equivalent to the reference for
    # positive unions; the reference itself produces NaN when a union is 0.
    resp1 = inter1 * union0 > inter0 * union1
    sel_inter = jnp.where(resp1, inter1, inter0)
    sel_union = jnp.where(resp1, union1, union0)
    max_iou = sel_inter / sel_union        # exact; kernel is DMA-bound -> free

    def sel(get, col):
        return jnp.where(resp1, get(5 + col), get(col))

    pr_x, pr_y, pr_w, pr_h, pr_c = tuple(sel(P, j) for j in range(5))
    lr_x, lr_y, lr_w, lr_h = tuple(sel(L, j) for j in range(4))

    dcf = pr_c - max_iou
    dx = pr_x - lr_x
    dy = pr_y - lr_y
    dw = pr_w - lr_w
    dh = pr_h - lr_h
    coord_sq = dx * dx + dy * dy + dw * dw + dh * dh
    # fuse conf + coord + cls into one masked array -> one accumulator lane
    obj_term = jnp.where(obj, dcf * dcf + LAMBDA_COORD * coord_sq + cls_sq, 0.0)

    acc_ref[0] += obj_term
    acc_ref[1] += noobj_sq
    acc_ref[2] += noobj.astype(jnp.float32)   # padded cells counted; fixed below

    @pl.when(g == pl.num_programs(0) - 1)
    def _finalize():
        t_obj = jnp.sum(acc_ref[0], axis=(0, 1), keepdims=True)    # (1, 1)
        t_nsq = jnp.sum(acc_ref[1], axis=(0, 1), keepdims=True)
        t_cnt = jnp.sum(acc_ref[2], axis=(0, 1), keepdims=True)
        t_cnt = t_cnt - jnp.float32(pad_cells)      # static pad correction
        denom = jnp.maximum(2.0 * t_cnt, 1.0)       # guard: all-object input
        loss = (LAMBDA_NOOBJ * (t_nsq / denom) + t_obj) * jnp.float32(inv_batch)
        out_ref[...] = jnp.broadcast_to(loss, out_ref.shape)


# -------------------------------- wrapper ---------------------------------- #

def _relayout(x, m, rows_pad):
    # [batch, S, S, N_CH] -> channel-major lane-dense [N_CH, rows_pad, 128].
    # With allow_input_fusion, XLA may fuse this transpose/pad straight into
    # the pallas_call operand instead of materializing a second HBM copy.
    x = jnp.moveaxis(x, -1, 0).reshape(N_CH, m)
    x = jnp.pad(x, ((0, 0), (0, rows_pad * 128 - m)))
    return x.reshape(N_CH, rows_pad, 128)


@functools.partial(jax.jit, static_argnames=("tile_rows_max",))
def yolo_v1_loss(pred_tensor, label_tensor, tile_rows_max=TILE_ROWS_MAX):
    assert tile_rows_max % 8 == 0
    batch = pred_tensor.shape[0]
    m = batch * S * S
    rows = -(-m // 128)
    rows8 = -(-rows // 8) * 8                  # keep tiles sublane-aligned
    if rows8 <= tile_rows_max:
        tr, rows_pad = rows8, rows8
    else:
        tr = tile_rows_max
        rows_pad = -(-rows8 // tr) * tr
    grid = (rows_pad // tr,)
    pad_cells = rows_pad * 128 - m             # zero-padded (no-object) cells

    pred = _relayout(pred_tensor, m, rows_pad)
    label = _relayout(label_tensor, m, rows_pad)

    in_spec = pl.BlockSpec((N_CH, tr, 128), lambda g: (0, g, 0))
    out_spec = pl.BlockSpec((8, 128), lambda g: (0, 0))

    kernel = functools.partial(yolo_v1_loss_kernel,
                               pad_cells=pad_cells,
                               inv_batch=1.0 / float(batch))
    out = pl.pallas_call(
        kernel,
        grid=grid,
        in_specs=[in_spec, in_spec],
        out_specs=out_spec,
        out_shape=jax.ShapeDtypeStruct((8, 128), jnp.float32),
        scratch_shapes=[pltpu.VMEM((3, tr, 128), jnp.float32)],
        compiler_params=pltpu.CompilerParams(
            # accumulation across the grid axis -> must stay sequential
            dimension_semantics=("arbitrary",),
            vmem_limit_bytes=32 * 1024 * 1024,
            # let XLA fuse the wrapper transpose/pad into the operands
            allow_input_fusion=[True, True]),
    )(pred, label)
    return out[0, 0]


# ------------------------- numpy reference (torch-faithful) ---------------- #

def _compute_iou_np(box1, box2):
    lt = np.maximum(box1[:, None, :2], box2[None, :, :2])
    rb = np.minimum(box1[:, None, 2:], box2[None, :, 2:])
    wh = np.clip(rb - lt, 0.0, None)
    inter = wh[:, :, 0] * wh[:, :, 1]
    area1 = (box1[:, 2] - box1[:, 0]) * (box1[:, 3] - box1[:, 1])
    area2 = (box2[:, 2] - box2[:, 0]) * (box2[:, 3] - box2[:, 1])
    return inter / (area1[:, None] + area2[None, :] - inter)


def ref_loss_np(pred, label):
    pred = np.asarray(pred, dtype=np.float64)
    label = np.asarray(label, dtype=np.float64)
    batch = pred.shape[0]
    obj_mask = label[..., 4] > 0
    noobj_mask = label[..., 4] == 0

    obj_pred = pred[obj_mask].reshape(-1, N_CH)
    bbox_pred = obj_pred[:, :5 * B].reshape(-1, 5)
    cls_pred = obj_pred[:, 5 * B:]
    obj_label = label[obj_mask].reshape(-1, N_CH)
    bbox_label = obj_label[:, :5 * B].reshape(-1, 5)
    cls_label = obj_label[:, 5 * B:]

    noobj_pred = pred[noobj_mask].reshape(-1, N_CH)
    noobj_label = label[noobj_mask].reshape(-1, N_CH)
    diff = np.concatenate([noobj_pred[:, 4] - noobj_label[:, 4],
                           noobj_pred[:, 9] - noobj_label[:, 9]])
    loss_noobj = np.mean(diff ** 2)        # legacy reduce='sum' -> 'mean'

    resp_mask = np.zeros(bbox_label.shape[0], dtype=bool)
    iou_store = np.zeros(bbox_label.shape[0])
    for i in range(0, bbox_label.shape[0], 2):
        bp = bbox_pred[i:i + B]
        bp_xyxy = np.zeros((B, 4))
        bp_xyxy[:, :2] = bp[:, :2] / S - 0.5 * bp[:, 2:4]
        bp_xyxy[:, 2:4] = bp[:, :2] / S + 0.5 * bp[:, 2:4]
        bl = bbox_label[i:i + 1]
        bl_xyxy = np.zeros((1, 4))
        bl_xyxy[:, :2] = bl[:, :2] / S - 0.5 * bl[:, 2:4]
        bl_xyxy[:, 2:4] = bl[:, :2] / S + 0.5 * bl[:, 2:4]
        iou = _compute_iou_np(bp_xyxy, bl_xyxy)[:, 0]
        mi = int(np.argmax(iou))
        resp_mask[i + mi] = True
        iou_store[i + mi] = iou[mi]

    pr = bbox_pred[resp_mask]
    lr = bbox_label[resp_mask]
    li = iou_store[resp_mask]
    loss_conf = np.sum((pr[:, 4] - li) ** 2)
    loss_xy = np.sum((pr[:, :2] - lr[:, :2]) ** 2)
    loss_wh = np.sum((pr[:, 2:4] - lr[:, 2:4]) ** 2)
    loss_cls = np.sum((cls_pred - cls_label) ** 2)
    loss = (LAMBDA_NOOBJ * loss_noobj + loss_conf
            + LAMBDA_COORD * (loss_xy + loss_wh) + loss_cls)
    return loss / batch


# ---------------------------------- main ----------------------------------- #

if __name__ == "__main__":
    key = jax.random.PRNGKey(0)

    def make_inputs(k, batch, obj_cells):
        k_pred, k_box = jax.random.split(k)
        pred = jax.random.uniform(k_pred, (batch, S, S, N_CH), dtype=jnp.float32)
        label = jnp.zeros((batch, S, S, N_CH), dtype=jnp.float32)
        boxes = jax.random.uniform(k_box, (len(obj_cells), 4), dtype=jnp.float32)
        boxes = boxes * jnp.array([1.0, 1.0, 0.8, 0.8], jnp.float32) \
                      + jnp.array([0.0, 0.0, 0.1, 0.1], jnp.float32)
        for idx, (b, i, j, cls) in enumerate(obj_cells):
            bx = boxes[idx]
            one = jnp.ones((1,), dtype=jnp.float32)
            cls_vec = jax.nn.one_hot(cls, C, dtype=jnp.float32)
            row = jnp.concatenate([bx, one, bx, one, cls_vec])
            label = label.at[b, i, j].set(row)
        return pred, label

    k1, k2 = jax.random.split(key)

    # small batch: single-block path (grid == 1, finalize-in-kernel)
    pred, label = make_inputs(
        k1, 2, [(0, 1, 2, 0), (0, 4, 5, 1), (1, 3, 3, 1), (1, 6, 0, 0)])
    loss = jax.block_until_ready(yolo_v1_loss(pred, label))
    ref = ref_loss_np(np.asarray(pred), np.asarray(label))
    np.testing.assert_allclose(float(loss), float(ref), rtol=5e-4, atol=5e-4)

    # larger batch with a small forced tile: multi-block accumulate path
    pred2, label2 = make_inputs(
        k2, 24, [(0, 0, 0, 0), (5, 2, 3, 1), (11, 6, 6, 0), (23, 4, 1, 1)])
    loss2 = jax.block_until_ready(yolo_v1_loss(pred2, label2, tile_rows_max=8))
    ref2 = ref_loss_np(np.asarray(pred2), np.asarray(label2))
    np.testing.assert_allclose(float(loss2), float(ref2), rtol=5e-4, atol=5e-4)

    if not (np.isfinite(float(loss)) and np.isfinite(float(loss2))):
        raise RuntimeError("non-finite loss from kernel")
    print("KERNEL_OK")
</pallas_src>

<mosaic_0001>
module attributes {stable_mosaic.version = 11 : i64} {
  func.func @yolo_v1_loss_kernel(%arg0: i32, %arg1: memref<12x8x128xf32, #tpu.memory_space<vmem>>, %arg2: memref<12x8x128xf32, #tpu.memory_space<vmem>>, %arg3: memref<8x128xf32, #tpu.memory_space<vmem>>, %arg4: memref<3x8x128xf32, #tpu.memory_space<vmem>>) attributes {dimension_semantics = [#tpu.dimension_semantics<arbitrary>], iteration_bounds = array<i64: 1>, scalar_prefetch = 0 : i64, scratch_operands = 1 : i64, tpu.core_type = #tpu.core_type<tc>, window_params = [{transform_indices = @transform_0, window_bounds = array<i64: 12, 8, 128>}, {transform_indices = @transform_1, window_bounds = array<i64: 12, 8, 128>}, {pipeline_mode = #tpu.pipeline_mode<synchronous>, transform_indices = @transform_2, window_bounds = array<i64: 8, 128>}]} {
    %c0_i32 = arith.constant 0 : i32
    %0 = arith.cmpi eq, %arg0, %c0_i32 : i32
    %1 = arith.extui %0 : i1 to i32
    %c0_i32_0 = arith.constant 0 : i32
    %2 = arith.cmpi ne, %1, %c0_i32_0 : i32
    scf.if %2 {
      %cst_108 = arith.constant 0.000000e+00 : f32
      %212 = vector.broadcast %cst_108 : f32 to vector<3x8x128xf32>
      %c0_109 = arith.constant 0 : index
      %c0_110 = arith.constant 0 : index
      %c0_111 = arith.constant 0 : index
      %213 = vector.load %arg4[%c0_109, %c0_110, %c0_111] : memref<3x8x128xf32, #tpu.memory_space<vmem>>, vector<3x8x128xf32>
      tpu.vector_store %arg4[%c0_109, %c0_110, %c0_111], %212 {strides = array<i32>} : memref<3x8x128xf32, #tpu.memory_space<vmem>>, vector<3x8x128xf32>,
    } else {
    }
    %c4 = arith.constant 4 : index
    %c0 = arith.constant 0 : index
    %c0_1 = arith.constant 0 : index
    %3 = vector.load %arg2[%c4, %c0, %c0_1] : memref<12x8x128xf32, #tpu.memory_space<vmem>>, vector<1x8x128xf32>
    %4 = vector.shape_cast %3 : vector<1x8x128xf32> to vector<8x128xf32>
    %cst = arith.constant 0.000000e+00 : f32
    %5 = vector.broadcast %cst : f32 to vector<8x128xf32>
    %6 = arith.cmpf ogt, %4, %5 : vector<8x128xf32>
    %cst_2 = arith.constant 0.000000e+00 : f32
    %7 = vector.broadcast %cst_2 : f32 to vector<8x128xf32>
    %8 = arith.cmpf oeq, %4, %7 : vector<8x128xf32>
    %c4_3 = arith.constant 4 : index
    %c0_4 = arith.constant 0 : index
    %c0_5 = arith.constant 0 : index
    %9 = vector.load %arg1[%c4_3, %c0_4, %c0_5] : memref<12x8x128xf32, #tpu.memory_space<vmem>>, vector<1x8x128xf32>
    %10 = vector.shape_cast %9 : vector<1x8x128xf32> to vector<8x128xf32>
    %11 = arith.subf %10, %4 : vector<8x128xf32>
    %c9 = arith.constant 9 : index
    %c0_6 = arith.constant 0 : index
    %c0_7 = arith.constant 0 : index
    %12 = vector.load %arg1[%c9, %c0_6, %c0_7] : memref<12x8x128xf32, #tpu.memory_space<vmem>>, vector<1x8x128xf32>
    %13 = vector.shape_cast %12 : vector<1x8x128xf32> to vector<8x128xf32>
    %c9_8 = arith.constant 9 : index
    %c0_9 = arith.constant 0 : index
    %c0_10 = arith.constant 0 : index
    %14 = vector.load %arg2[%c9_8, %c0_9, %c0_10] : memref<12x8x128xf32, #tpu.memory_space<vmem>>, vector<1x8x128xf32>
    %15 = vector.shape_cast %14 : vector<1x8x128xf32> to vector<8x128xf32>
    %16 = arith.subf %13, %15 : vector<8x128xf32>
    %17 = arith.mulf %11, %11 : vector<8x128xf32>
    %18 = arith.mulf %16, %16 : vector<8x128xf32>
    %19 = arith.addf %17, %18 : vector<8x128xf32>
    %cst_11 = arith.constant 0.000000e+00 : f32
    %20 = vector.broadcast %cst_11 : f32 to vector<8x128xf32>
    %21 = arith.select %8, %19, %20 : vector<8x128xi1>, vector<8x128xf32>
    %cst_12 = arith.constant 0.000000e+00 : f32
    %22 = vector.broadcast %cst_12 : f32 to vector<8x128xf32>
    %c10 = arith.constant 10 : index
    %c0_13 = arith.constant 0 : index
    %c0_14 = arith.constant 0 : index
    %23 = vector.load %arg1[%c10, %c0_13, %c0_14] : memref<12x8x128xf32, #tpu.memory_space<vmem>>, vector<1x8x128xf32>
    %24 = vector.shape_cast %23 : vector<1x8x128xf32> to vector<8x128xf32>
    %c10_15 = arith.constant 10 : index
    %c0_16 = arith.constant 0 : index
    %c0_17 = arith.constant 0 : index
    %25 = vector.load %arg2[%c10_15, %c0_16, %c0_17] : memref<12x8x128xf32, #tpu.memory_space<vmem>>, vector<1x8x128xf32>
    %26 = vector.shape_cast %25 : vector<1x8x128xf32> to vector<8x128xf32>
    %27 = arith.subf %24, %26 : vector<8x128xf32>
    %28 = arith.mulf %27, %27 : vector<8x128xf32>
    %29 = arith.addf %22, %28 : vector<8x128xf32>
    %c11 = arith.constant 11 : index
    %c0_18 = arith.constant 0 : index
    %c0_19 = arith.constant 0 : index
    %30 = vector.load %arg1[%c11, %c0_18, %c0_19] : memref<12x8x128xf32, #tpu.memory_space<vmem>>, vector<1x8x128xf32>
    %31 = vector.shape_cast %30 : vector<1x8x128xf32> to vector<8x128xf32>
    %c11_20 = arith.constant 11 : index
    %c0_21 = arith.constant 0 : index
    %c0_22 = arith.constant 0 : index
    %32 = vector.load %arg2[%c11_20, %c0_21, %c0_22] : memref<12x8x128xf32, #tpu.memory_space<vmem>>, vector<1x8x128xf32>
    %33 = vector.shape_cast %32 : vector<1x8x128xf32> to vector<8x128xf32>
    %34 = arith.subf %31, %33 : vector<8x128xf32>
    %35 = arith.mulf %34, %34 : vector<8x128xf32>
    %36 = arith.addf %29, %35 : vector<8x128xf32>
    %c0_23 = arith.constant 0 : index
    %c0_24 = arith.constant 0 : index
    %c0_25 = arith.constant 0 : index
    %37 = vector.load %arg2[%c0_23, %c0_24, %c0_25] : memref<12x8x128xf32, #tpu.memory_space<vmem>>, vector<1x8x128xf32>
    %38 = vector.shape_cast %37 : vector<1x8x128xf32> to vector<8x128xf32>
    %cst_26 = arith.constant 0.142857149 : f32
    %39 = vector.broadcast %cst_26 : f32 to vector<8x128xf32>
    %40 = arith.mulf %38, %39 : vector<8x128xf32>
    %c1 = arith.constant 1 : index
    %c0_27 = arith.constant 0 : index
    %c0_28 = arith.constant 0 : index
    %41 = vector.load %arg2[%c1, %c0_27, %c0_28] : memref<12x8x128xf32, #tpu.memory_space<vmem>>, vector<1x8x128xf32>
    %42 = vector.shape_cast %41 : vector<1x8x128xf32> to vector<8x128xf32>
    %cst_29 = arith.constant 0.142857149 : f32
    %43 = vector.broadcast %cst_29 : f32 to vector<8x128xf32>
    %44 = arith.mulf %42, %43 : vector<8x128xf32>
    %c2 = arith.constant 2 : index
    %c0_30 = arith.constant 0 : index
    %c0_31 = arith.constant 0 : index
    %45 = vector.load %arg2[%c2, %c0_30, %c0_31] : memref<12x8x128xf32, #tpu.memory_space<vmem>>, vector<1x8x128xf32>
    %46 = vector.shape_cast %45 : vector<1x8x128xf32> to vector<8x128xf32>
    %c3 = arith.constant 3 : index
    %c0_32 = arith.constant 0 : index
    %c0_33 = arith.constant 0 : index
    %47 = vector.load %arg2[%c3, %c0_32, %c0_33] : memref<12x8x128xf32, #tpu.memory_space<vmem>>, vector<1x8x128xf32>
    %48 = vector.shape_cast %47 : vector<1x8x128xf32> to vector<8x128xf32>
    %cst_34 = arith.constant 5.000000e-01 : f32
    %49 = vector.broadcast %cst_34 : f32 to vector<8x128xf32>
    %50 = arith.mulf %49, %46 : vector<8x128xf32>
    %51 = arith.subf %40, %50 : vector<8x128xf32>
    %cst_35 = arith.constant 5.000000e-01 : f32
    %52 = vector.broadcast %cst_35 : f32 to vector<8x128xf32>
    %53 = arith.mulf %52, %48 : vector<8x128xf32>
    %54 = arith.subf %44, %53 : vector<8x128xf32>
    %cst_36 = arith.constant 5.000000e-01 : f32
    %55 = vector.broadcast %cst_36 : f32 to vector<8x128xf32>
    %56 = arith.mulf %55, %46 : vector<8x128xf32>
    %57 = arith.addf %40, %56 : vector<8x128xf32>
    %cst_37 = arith.constant 5.000000e-01 : f32
    %58 = vector.broadcast %cst_37 : f32 to vector<8x128xf32>
    %59 = arith.mulf %58, %48 : vector<8x128xf32>
    %60 = arith.addf %44, %59 : vector<8x128xf32>
    %c0_38 = arith.constant 0 : index
    %c0_39 = arith.constant 0 : index
    %c0_40 = arith.constant 0 : index
    %61 = vector.load %arg1[%c0_38, %c0_39, %c0_40] : memref<12x8x128xf32, #tpu.memory_space<vmem>>, vector<1x8x128xf32>
    %62 = vector.shape_cast %61 : vector<1x8x128xf32> to vector<8x128xf32>
    %cst_41 = arith.constant 0.142857149 : f32
    %63 = vector.broadcast %cst_41 : f32 to vector<8x128xf32>
    %64 = arith.mulf %62, %63 : vector<8x128xf32>
    %c1_42 = arith.constant 1 : index
    %c0_43 = arith.constant 0 : index
    %c0_44 = arith.constant 0 : index
    %65 = vector.load %arg1[%c1_42, %c0_43, %c0_44] : memref<12x8x128xf32, #tpu.memory_space<vmem>>, vector<1x8x128xf32>
    %66 = vector.shape_cast %65 : vector<1x8x128xf32> to vector<8x128xf32>
    %cst_45 = arith.constant 0.142857149 : f32
    %67 = vector.broadcast %cst_45 : f32 to vector<8x128xf32>
    %68 = arith.mulf %66, %67 : vector<8x128xf32>
    %c2_46 = arith.constant 2 : index
    %c0_47 = arith.constant 0 : index
    %c0_48 = arith.constant 0 : index
    %69 = vector.load %arg1[%c2_46, %c0_47, %c0_48] : memref<12x8x128xf32, #tpu.memory_space<vmem>>, vector<1x8x128xf32>
    %70 = vector.shape_cast %69 : vector<1x8x128xf32> to vector<8x128xf32>
    %c3_49 = arith.constant 3 : index
    %c0_50 = arith.constant 0 : index
    %c0_51 = arith.constant 0 : index
    %71 = vector.load %arg1[%c3_49, %c0_50, %c0_51] : memref<12x8x128xf32, #tpu.memory_space<vmem>>, vector<1x8x128xf32>
    %72 = vector.shape_cast %71 : vector<1x8x128xf32> to vector<8x128xf32>
    %cst_52 = arith.constant 5.000000e-01 : f32
    %73 = vector.broadcast %cst_52 : f32 to vector<8x128xf32>
    %74 = arith.mulf %73, %70 : vector<8x128xf32>
    %75 = arith.subf %64, %74 : vector<8x128xf32>
    %cst_53 = arith.constant 5.000000e-01 : f32
    %76 = vector.broadcast %cst_53 : f32 to vector<8x128xf32>
    %77 = arith.mulf %76, %72 : vector<8x128xf32>
    %78 = arith.subf %68, %77 : vector<8x128xf32>
    %cst_54 = arith.constant 5.000000e-01 : f32
    %79 = vector.broadcast %cst_54 : f32 to vector<8x128xf32>
    %80 = arith.mulf %79, %70 : vector<8x128xf32>
    %81 = arith.addf %64, %80 : vector<8x128xf32>
    %cst_55 = arith.constant 5.000000e-01 : f32
    %82 = vector.broadcast %cst_55 : f32 to vector<8x128xf32>
    %83 = arith.mulf %82, %72 : vector<8x128xf32>
    %84 = arith.addf %68, %83 : vector<8x128xf32>
    %85 = arith.minimumf %81, %57 : vector<8x128xf32>
    %86 = arith.maximumf %75, %51 : vector<8x128xf32>
    %87 = arith.subf %85, %86 : vector<8x128xf32>
    %cst_56 = arith.constant 0.000000e+00 : f32
    %88 = vector.broadcast %cst_56 : f32 to vector<8x128xf32>
    %89 = arith.maximumf %87, %88 : vector<8x128xf32>
    %90 = arith.minimumf %84, %60 : vector<8x128xf32>
    %91 = arith.maximumf %78, %54 : vector<8x128xf32>
    %92 = arith.subf %90, %91 : vector<8x128xf32>
    %cst_57 = arith.constant 0.000000e+00 : f32
    %93 = vector.broadcast %cst_57 : f32 to vector<8x128xf32>
    %94 = arith.maximumf %92, %93 : vector<8x128xf32>
    %95 = arith.mulf %89, %94 : vector<8x128xf32>
    %96 = arith.subf %81, %75 : vector<8x128xf32>
    %97 = arith.subf %84, %78 : vector<8x128xf32>
    %98 = arith.mulf %96, %97 : vector<8x128xf32>
    %99 = arith.subf %57, %51 : vector<8x128xf32>
    %100 = arith.subf %60, %54 : vector<8x128xf32>
    %101 = arith.mulf %99, %100 : vector<8x128xf32>
    %102 = arith.addf %98, %101 : vector<8x128xf32>
    %103 = arith.subf %102, %95 : vector<8x128xf32>
    %c5 = arith.constant 5 : index
    %c0_58 = arith.constant 0 : index
    %c0_59 = arith.constant 0 : index
    %104 = vector.load %arg1[%c5, %c0_58, %c0_59] : memref<12x8x128xf32, #tpu.memory_space<vmem>>, vector<1x8x128xf32>
    %105 = vector.shape_cast %104 : vector<1x8x128xf32> to vector<8x128xf32>
    %cst_60 = arith.constant 0.142857149 : f32
    %106 = vector.broadcast %cst_60 : f32 to vector<8x128xf32>
    %107 = arith.mulf %105, %106 : vector<8x128xf32>
    %c6 = arith.constant 6 : index
    %c0_61 = arith.constant 0 : index
    %c0_62 = arith.constant 0 : index
    %108 = vector.load %arg1[%c6, %c0_61, %c0_62] : memref<12x8x128xf32, #tpu.memory_space<vmem>>, vector<1x8x128xf32>
    %109 = vector.shape_cast %108 : vector<1x8x128xf32> to vector<8x128xf32>
    %cst_63 = arith.constant 0.142857149 : f32
    %110 = vector.broadcast %cst_63 : f32 to vector<8x128xf32>
    %111 = arith.mulf %109, %110 : vector<8x128xf32>
    %c7 = arith.constant 7 : index
    %c0_64 = arith.constant 0 : index
    %c0_65 = arith.constant 0 : index
    %112 = vector.load %arg1[%c7, %c0_64, %c0_65] : memref<12x8x128xf32, #tpu.memory_space<vmem>>, vector<1x8x128xf32>
    %113 = vector.shape_cast %112 : vector<1x8x128xf32> to vector<8x128xf32>
    %c8 = arith.constant 8 : index
    %c0_66 = arith.constant 0 : index
    %c0_67 = arith.constant 0 : index
    %114 = vector.load %arg1[%c8, %c0_66, %c0_67] : memref<12x8x128xf32, #tpu.memory_space<vmem>>, vector<1x8x128xf32>
    %115 = vector.shape_cast %114 : vector<1x8x128xf32> to vector<8x128xf32>
    %cst_68 = arith.constant 5.000000e-01 : f32
    %116 = vector.broadcast %cst_68 : f32 to vector<8x128xf32>
    %117 = arith.mulf %116, %113 : vector<8x128xf32>
    %118 = arith.subf %107, %117 : vector<8x128xf32>
    %cst_69 = arith.constant 5.000000e-01 : f32
    %119 = vector.broadcast %cst_69 : f32 to vector<8x128xf32>
    %120 = arith.mulf %119, %115 : vector<8x128xf32>
    %121 = arith.subf %111, %120 : vector<8x128xf32>
    %cst_70 = arith.constant 5.000000e-01 : f32
    %122 = vector.broadcast %cst_70 : f32 to vector<8x128xf32>
    %123 = arith.mulf %122, %113 : vector<8x128xf32>
    %124 = arith.addf %107, %123 : vector<8x128xf32>
    %cst_71 = arith.constant 5.000000e-01 : f32
    %125 = vector.broadcast %cst_71 : f32 to vector<8x128xf32>
    %126 = arith.mulf %125, %115 : vector<8x128xf32>
    %127 = arith.addf %111, %126 : vector<8x128xf32>
    %128 = arith.minimumf %124, %57 : vector<8x128xf32>
    %129 = arith.maximumf %118, %51 : vector<8x128xf32>
    %130 = arith.subf %128, %129 : vector<8x128xf32>
    %cst_72 = arith.constant 0.000000e+00 : f32
    %131 = vector.broadcast %cst_72 : f32 to vector<8x128xf32>
    %132 = arith.maximumf %130, %131 : vector<8x128xf32>
    %133 = arith.minimumf %127, %60 : vector<8x128xf32>
    %134 = arith.maximumf %121, %54 : vector<8x128xf32>
    %135 = arith.subf %133, %134 : vector<8x128xf32>
    %cst_73 = arith.constant 0.000000e+00 : f32
    %136 = vector.broadcast %cst_73 : f32 to vector<8x128xf32>
    %137 = arith.maximumf %135, %136 : vector<8x128xf32>
    %138 = arith.mulf %132, %137 : vector<8x128xf32>
    %139 = arith.subf %124, %118 : vector<8x128xf32>
    %140 = arith.subf %127, %121 : vector<8x128xf32>
    %141 = arith.mulf %139, %140 : vector<8x128xf32>
    %142 = arith.subf %57, %51 : vector<8x128xf32>
    %143 = arith.subf %60, %54 : vector<8x128xf32>
    %144 = arith.mulf %142, %143 : vector<8x128xf32>
    %145 = arith.addf %141, %144 : vector<8x128xf32>
    %146 = arith.subf %145, %138 : vector<8x128xf32>
    %147 = arith.mulf %138, %103 : vector<8x128xf32>
    %148 = arith.mulf %95, %146 : vector<8x128xf32>
    %149 = arith.cmpf ogt, %147, %148 : vector<8x128xf32>
    %150 = arith.select %149, %138, %95 : vector<8x128xi1>, vector<8x128xf32>
    %151 = arith.select %149, %146, %103 : vector<8x128xi1>, vector<8x128xf32>
    %152 = arith.divf %150, %151 : vector<8x128xf32>
    %153 = arith.select %149, %105, %62 : vector<8x128xi1>, vector<8x128xf32>
    %154 = arith.select %149, %109, %66 : vector<8x128xi1>, vector<8x128xf32>
    %155 = arith.select %149, %113, %70 : vector<8x128xi1>, vector<8x128xf32>
    %156 = arith.select %149, %115, %72 : vector<8x128xi1>, vector<8x128xf32>
    %157 = arith.select %149, %13, %10 : vector<8x128xi1>, vector<8x128xf32>
    %c5_74 = arith.constant 5 : index
    %c0_75 = arith.constant 0 : index
    %c0_76 = arith.constant 0 : index
    %158 = vector.load %arg2[%c5_74, %c0_75, %c0_76] : memref<12x8x128xf32, #tpu.memory_space<vmem>>, vector<1x8x128xf32>
    %159 = vector.shape_cast %158 : vector<1x8x128xf32> to vector<8x128xf32>
    %160 = arith.select %149, %159, %38 : vector<8x128xi1>, vector<8x128xf32>
    %c6_77 = arith.constant 6 : index
    %c0_78 = arith.constant 0 : index
    %c0_79 = arith.constant 0 : index
    %161 = vector.load %arg2[%c6_77, %c0_78, %c0_79] : memref<12x8x128xf32, #tpu.memory_space<vmem>>, vector<1x8x128xf32>
    %162 = vector.shape_cast %161 : vector<1x8x128xf32> to vector<8x128xf32>
    %163 = arith.select %149, %162, %42 : vector<8x128xi1>, vector<8x128xf32>
    %c7_80 = arith.constant 7 : index
    %c0_81 = arith.constant 0 : index
    %c0_82 = arith.constant 0 : index
    %164 = vector.load %arg2[%c7_80, %c0_81, %c0_82] : memref<12x8x128xf32, #tpu.memory_space<vmem>>, vector<1x8x128xf32>
    %165 = vector.shape_cast %164 : vector<1x8x128xf32> to vector<8x128xf32>
    %166 = arith.select %149, %165, %46 : vector<8x128xi1>, vector<8x128xf32>
    %c8_83 = arith.constant 8 : index
    %c0_84 = arith.constant 0 : index
    %c0_85 = arith.constant 0 : index
    %167 = vector.load %arg2[%c8_83, %c0_84, %c0_85] : memref<12x8x128xf32, #tpu.memory_space<vmem>>, vector<1x8x128xf32>
    %168 = vector.shape_cast %167 : vector<1x8x128xf32> to vector<8x128xf32>
    %169 = arith.select %149, %168, %48 : vector<8x128xi1>, vector<8x128xf32>
    %170 = arith.subf %157, %152 : vector<8x128xf32>
    %171 = arith.subf %153, %160 : vector<8x128xf32>
    %172 = arith.subf %154, %163 : vector<8x128xf32>
    %173 = arith.subf %155, %166 : vector<8x128xf32>
    %174 = arith.subf %156, %169 : vector<8x128xf32>
    %175 = arith.mulf %171, %171 : vector<8x128xf32>
    %176 = arith.mulf %172, %172 : vector<8x128xf32>
    %177 = arith.addf %175, %176 : vector<8x128xf32>
    %178 = arith.mulf %173, %173 : vector<8x128xf32>
    %179 = arith.addf %177, %178 : vector<8x128xf32>
    %180 = arith.mulf %174, %174 : vector<8x128xf32>
    %181 = arith.addf %179, %180 : vector<8x128xf32>
    %182 = arith.mulf %170, %170 : vector<8x128xf32>
    %cst_86 = arith.constant 5.000000e+00 : f32
    %183 = vector.broadcast %cst_86 : f32 to vector<8x128xf32>
    %184 = arith.mulf %183, %181 : vector<8x128xf32>
    %185 = arith.addf %182, %184 : vector<8x128xf32>
    %186 = arith.addf %185, %36 : vector<8x128xf32>
    %cst_87 = arith.constant 0.000000e+00 : f32
    %187 = vector.broadcast %cst_87 : f32 to vector<8x128xf32>
    %188 = arith.select %6, %186, %187 : vector<8x128xi1>, vector<8x128xf32>
    %c0_88 = arith.constant 0 : index
    %c0_89 = arith.constant 0 : index
    %c0_90 = arith.constant 0 : index
    %189 = vector.load %arg4[%c0_88, %c0_89, %c0_90] : memref<3x8x128xf32, #tpu.memory_space<vmem>>, vector<1x8x128xf32>
    %190 = vector.shape_cast %189 : vector<1x8x128xf32> to vector<8x128xf32>
    %191 = arith.addf %190, %188 : vector<8x128xf32>
    %c0_91 = arith.constant 0 : index
    %c0_92 = arith.constant 0 : index
    %c0_93 = arith.constant 0 : index
    %192 = vector.load %arg4[%c0_91, %c0_92, %c0_93] : memref<3x8x128xf32, #tpu.memory_space<vmem>>, vector<1x8x128xf32>
    %193 = vector.shape_cast %192 : vector<1x8x128xf32> to vector<8x128xf32>
    %194 = vector.shape_cast %191 : vector<8x128xf32> to vector<1x8x128xf32>
    tpu.vector_store %arg4[%c0_91, %c0_92, %c0_93], %194 {strides = array<i32>} : memref<3x8x128xf32, #tpu.memory_space<vmem>>, vector<1x8x128xf32>,
    %c1_94 = arith.constant 1 : index
    %c0_95 = arith.constant 0 : index
    %c0_96 = arith.constant 0 : index
    %195 = vector.load %arg4[%c1_94, %c0_95, %c0_96] : memref<3x8x128xf32, #tpu.memory_space<vmem>>, vector<1x8x128xf32>
    %196 = vector.shape_cast %195 : vector<1x8x128xf32> to vector<8x128xf32>
    %197 = arith.addf %196, %21 : vector<8x128xf32>
    %c1_97 = arith.constant 1 : index
    %c0_98 = arith.constant 0 : index
    %c0_99 = arith.constant 0 : index
    %198 = vector.load %arg4[%c1_97, %c0_98, %c0_99] : memref<3x8x128xf32, #tpu.memory_space<vmem>>, vector<1x8x128xf32>
    %199 = vector.shape_cast %198 : vector<1x8x128xf32> to vector<8x128xf32>
    %200 = vector.shape_cast %197 : vector<8x128xf32> to vector<1x8x128xf32>
    tpu.vector_store %arg4[%c1_97, %c0_98, %c0_99], %200 {strides = array<i32>} : memref<3x8x128xf32, #tpu.memory_space<vmem>>, vector<1x8x128xf32>,
    %c2_100 = arith.constant 2 : index
    %c0_101 = arith.constant 0 : index
    %c0_102 = arith.constant 0 : index
    %201 = vector.load %arg4[%c2_100, %c0_101, %c0_102] : memref<3x8x128xf32, #tpu.memory_space<vmem>>, vector<1x8x128xf32>
    %202 = vector.shape_cast %201 : vector<1x8x128xf32> to vector<8x128xf32>
    %203 = arith.extui %8 : vector<8x128xi1> to vector<8x128xi32>
    %204 = arith.sitofp %203 : vector<8x128xi32> to vector<8x128xf32>
    %205 = arith.addf %202, %204 : vector<8x128xf32>
    %c2_103 = arith.constant 2 : index
    %c0_104 = arith.constant 0 : index
    %c0_105 = arith.constant 0 : index
    %206 = vector.load %arg4[%c2_103, %c0_104, %c0_105] : memref<3x8x128xf32, #tpu.memory_space<vmem>>, vector<1x8x128xf32>
    %207 = vector.shape_cast %206 : vector<1x8x128xf32> to vector<8x128xf32>
    %208 = vector.shape_cast %205 : vector<8x128xf32> to vector<1x8x128xf32>
    tpu.vector_store %arg4[%c2_103, %c0_104, %c0_105], %208 {strides = array<i32>} : memref<3x8x128xf32, #tpu.memory_space<vmem>>, vector<1x8x128xf32>,
    %c0_i32_106 = arith.constant 0 : i32
    %209 = arith.cmpi eq, %arg0, %c0_i32_106 : i32
    %210 = arith.extui %209 : i1 to i32
    %c0_i32_107 = arith.constant 0 : i32
    %211 = arith.cmpi ne, %210, %c0_i32_107 : i32
    scf.if %211 {
      %c0_108 = arith.constant 0 : index
      %c0_109 = arith.constant 0 : index
      %c0_110 = arith.constant 0 : index
      %212 = vector.load %arg4[%c0_108, %c0_109, %c0_110] : memref<3x8x128xf32, #tpu.memory_space<vmem>>, vector<1x8x128xf32>
      %213 = vector.shape_cast %212 : vector<1x8x128xf32> to vector<8x128xf32>
      %214 = vector.shape_cast %213 : vector<8x128xf32> to vector<1x8x128xf32>
      %cst_111 = arith.constant dense<0.000000e+00> : vector<1xf32>
      %215 = vector.multi_reduction <add>, %214, %cst_111 [1, 2] : vector<1x8x128xf32> to vector<1xf32>
      %216 = vector.shape_cast %215 : vector<1xf32> to vector<1x1x1xf32>
      %217 = vector.extract %216[0, 0, 0] : f32 from vector<1x1x1xf32>
      %218 = vector.broadcast %217 : f32 to vector<1x1xf32>
      %c1_112 = arith.constant 1 : index
      %c0_113 = arith.constant 0 : index
      %c0_114 = arith.constant 0 : index
      %219 = vector.load %arg4[%c1_112, %c0_113, %c0_114] : memref<3x8x128xf32, #tpu.memory_space<vmem>>, vector<1x8x128xf32>
      %220 = vector.shape_cast %219 : vector<1x8x128xf32> to vector<8x128xf32>
      %221 = vector.shape_cast %220 : vector<8x128xf32> to vector<1x8x128xf32>
      %cst_115 = arith.constant dense<0.000000e+00> : vector<1xf32>
      %222 = vector.multi_reduction <add>, %221, %cst_115 [1, 2] : vector<1x8x128xf32> to vector<1xf32>
      %223 = vector.shape_cast %222 : vector<1xf32> to vector<1x1x1xf32>
      %224 = vector.extract %223[0, 0, 0] : f32 from vector<1x1x1xf32>
      %225 = vector.broadcast %224 : f32 to vector<1x1xf32>
      %c2_116 = arith.constant 2 : index
      %c0_117 = arith.constant 0 : index
      %c0_118 = arith.constant 0 : index
      %226 = vector.load %arg4[%c2_116, %c0_117, %c0_118] : memref<3x8x128xf32, #tpu.memory_space<vmem>>, vector<1x8x128xf32>
      %227 = vector.shape_cast %226 : vector<1x8x128xf32> to vector<8x128xf32>
      %228 = vector.shape_cast %227 : vector<8x128xf32> to vector<1x8x128xf32>
      %cst_119 = arith.constant dense<0.000000e+00> : vector<1xf32>
      %229 = vector.multi_reduction <add>, %228, %cst_119 [1, 2] : vector<1x8x128xf32> to vector<1xf32>
      %230 = vector.shape_cast %229 : vector<1xf32> to vector<1x1x1xf32>
      %231 = vector.extract %230[0, 0, 0] : f32 from vector<1x1x1xf32>
      %232 = vector.broadcast %231 : f32 to vector<1x1xf32>
      %cst_120 = arith.constant 9.260000e+02 : f32
      %233 = vector.broadcast %cst_120 : f32 to vector<1x1xf32>
      %234 = arith.subf %232, %233 : vector<1x1xf32>
      %cst_121 = arith.constant 2.000000e+00 : f32
      %235 = vector.broadcast %cst_121 : f32 to vector<1x1xf32>
      %236 = arith.mulf %235, %234 : vector<1x1xf32>
      %cst_122 = arith.constant 1.000000e+00 : f32
      %237 = vector.broadcast %cst_122 : f32 to vector<1x1xf32>
      %238 = arith.maximumf %236, %237 : vector<1x1xf32>
      %239 = arith.divf %225, %238 : vector<1x1xf32>
      %cst_123 = arith.constant 1.000000e-01 : f32
      %240 = vector.broadcast %cst_123 : f32 to vector<1x1xf32>
      %241 = arith.mulf %240, %239 : vector<1x1xf32>
      %242 = arith.addf %241, %218 : vector<1x1xf32>
      %cst_124 = arith.constant 5.000000e-01 : f32
      %243 = vector.broadcast %cst_124 : f32 to vector<1x1xf32>
      %244 = arith.mulf %242, %243 : vector<1x1xf32>
      %245 = vector.shape_cast %244 : vector<1x1xf32> to vector<1x1xf32>
      %246 = vector.broadcast %245 : vector<1x1xf32> to vector<8x128xf32>
      %c0_125 = arith.constant 0 : index
      %c0_126 = arith.constant 0 : index
      %247 = vector.load %arg3[%c0_125, %c0_126] : memref<8x128xf32, #tpu.memory_space<vmem>>, vector<8x128xf32>
      tpu.vector_store %arg3[%c0_125, %c0_126], %246 {strides = array<i32>} : memref<8x128xf32, #tpu.memory_space<vmem>>, vector<8x128xf32>,
    } else {
    }
    return
  }
  func.func @transform_0(%arg0: i32) -> (i32, i32, i32) {
    %c0_i32 = arith.constant 0 : i32
    %c0_i32_0 = arith.constant 0 : i32
    %c0_i32_1 = arith.constant 0 : i32
    return %c0_i32, %arg0, %c0_i32_0 : i32, i32, i32
  }
  func.func @transform_1(%arg0: i32) -> (i32, i32, i32) {
    %c0_i32 = arith.constant 0 : i32
    %c0_i32_0 = arith.constant 0 : i32
    %c0_i32_1 = arith.constant 0 : i32
    return %c0_i32, %arg0, %c0_i32_0 : i32, i32, i32
  }
  func.func @transform_2(%arg0: i32) -> (i32, i32) {
    %c0_i32 = arith.constant 0 : i32
    %c0_i32_0 = arith.constant 0 : i32
    %c0_i32_1 = arith.constant 0 : i32
    return %c0_i32, %c0_i32_0 : i32, i32
  }
}

</mosaic_0001>

<bundles_post_ra>
// kernel: yolo_v1_loss.2
= control target key start
LH: loop header
LB: loop body
LE: loop exit
PB: predicated region body
PF: predicated region fallthrough
CT: control target
= control target key end

     0   :  { %v379_v5 = vmov 0.0   ;;  %s553_s0 = inlined_call_operand.vmem [shape: f32[16,8,128], index: 0, kind: input, shape index: {}]   ;;  %s554_s1 = inlined_call_operand.vmem [shape: f32[16,8,128], index: 1, kind: input, shape index: {}]   ;;  %s555_s2 = inlined_call_operand.vmem [shape: f32[8,128], index: 2, kind: output, shape index: {}]  }
   0x1   :  { %v398_v0 = vld [vmem:[%s553_s0 + $0x20] sm:$0xff]  ;;  %v408_v2 = vld [vmem:[%s554_s1 + $0x8] sm:$0xff]  ;;  %v414_v3 = vld [vmem:[%s554_s1 + $0x10] sm:$0xff] }
   0x2   :  { %v403_v1 = vld [vmem:[%s554_s1] sm:$0xff]  ;;  %vm137_vm0 = vcmp.eq.f32.partialorder %v398_v0, 0.0  ;;  %v419_v4 = vld [vmem:[%s554_s1 + $0x18] sm:$0xff]  ;;  %v426_v7 = vld [vmem:[%s554_s1 + $0x28] sm:$0xff]  ;;  %v183_v10 = vmul.f32 0.14285715, %v408_v2 }
   0x3   :  { %v366_v6 = vsel %vm137_vm0, 1.0, %v379_v5  ;;  %v431_v8 = vld [vmem:[%s554_s1 + $0x38] sm:$0xff]  ;;  %v180_v9 = vmul.f32 0.14285715, %v403_v1  ;;  %v188_v11 = vmul.f32 0.5, %v414_v3  ;;  %v439_v12 = vld [vmem:[%s553_s0] sm:$0xff] }
   0x4   :  { %321 = vadd.xlane.f32.xlu1 %v366_v6  ;;  %v444_v13 = vld [vmem:[%s553_s0 + $0x8] sm:$0xff]  ;;  %v190_v14 = vmul.f32 0.5, %v419_v4  ;;  %v213_v15 = vmul.f32 0.14285715, %v426_v7  ;;  %v451_v16 = vld [vmem:[%s554_s1 + $0x30] sm:$0xff]  ;;  %v461_v18 = vld [vmem:[%s553_s0 + $0x18] sm:$0xff] }
   0x5   :  { %v456_v17 = vld [vmem:[%s553_s0 + $0x10] sm:$0xff]  ;;  %v165_v19 = vmul.f32 0.14285715, %v439_v12  ;;  %v189_v20 = vsub.f32 %v180_v9, %v188_v11  ;;  %v192_v21 = vadd.f32 %v188_v11, %v180_v9  ;;  %v221_v22 = vmul.f32 0.5, %v431_v8  ;;  %v468_v23 = vld [vmem:[%s554_s1 + $0x40] sm:$0xff] }
   0x6   :  { %v168_v24 = vmul.f32 0.14285715, %v444_v13  ;;  %v173_v25 = vmul.f32 0.5, %v456_v17  ;;  %v175_v26 = vmul.f32 0.5, %v461_v18  ;;  %v191_v27 = vsub.f32 %v183_v10, %v190_v14 }
   0x7   :  { %v193_v28 = vadd.f32 %v190_v14, %v183_v10  ;;  %v203_v29 = vsub.f32 %v192_v21, %v189_v20  ;;  %v216_v32 = vmul.f32 0.14285715, %v451_v16  ;;  %v222_v33 = vsub.f32 %v213_v15, %v221_v22 }
   0x8   :  { %v174_v30 = vsub.f32 %v165_v19, %v173_v25  ;;  %v177_v31 = vadd.f32 %v173_v25, %v165_v19  ;;  %v176_v34 = vsub.f32 %v168_v24, %v175_v26  ;;  %v178_v35 = vadd.f32 %v175_v26, %v168_v24  ;;  %v362_v24 = vld [vmem:[%s553_s0 + $0x40] sm:$0xff] }
   0x9   :  { %v204_v36 = vsub.f32 %v193_v28, %v191_v27  ;;  %v223_v37 = vmul.f32 0.5, %v468_v23  ;;  %v225_v48 = vadd.f32 %v221_v22, %v213_v15  ;;  %v361_v22 = vld [vmem:[%s553_s0 + $0x38] sm:$0xff]  ;;  %vm136_vm2 = vcmp.gt.f32.partialorder %v398_v0, 0.0 }
   0xa   :  { %v194_v38 = vmin.f32 %v192_v21, %v177_v31  ;;  %v195_v39 = vmax.f32 %v189_v20, %v174_v30  ;;  %v198_v40 = vmin.f32 %v193_v28, %v178_v35  ;;  %v199_v41 = vmax.f32 %v191_v27, %v176_v34  ;;  %v359_v20 = vld [vmem:[%s553_s0 + $0x28] sm:$0xff]  ;;  %v360_v21 = vld [vmem:[%s553_s0 + $0x30] sm:$0xff] }
   0xb   :  { %v206_v42 = vsub.f32 %v177_v31, %v174_v30  ;;  %v205_v44 = vmul.f32 %v204_v36, %v203_v29  ;;  %v207_v45 = vsub.f32 %v178_v35, %v176_v34  ;;  %v224_v46 = vsub.f32 %v216_v32, %v223_v37  ;;  %v347_v36 = vld [vmem:[%s554_s1 + $0x20] sm:$0xff] }
   0xc   :  { %v196_v43 = vsub.f32 %v194_v38, %v195_v39  ;;  %v200_v47 = vsub.f32 %v198_v40, %v199_v41  ;;  %v226_v49 = vadd.f32 %v223_v37, %v216_v32  ;;  %v228_v50 = vmax.f32 %v222_v33, %v174_v30  ;;  %v352_v37 = vld [vmem:[%s554_s1 + $0x48] sm:$0xff] }
   0xd   :  { %v208_v52 = vmul.f32 %v207_v45, %v206_v42  ;;  %v232_v53 = vmax.f32 %v224_v46, %v176_v34  ;;  %v227_v55 = vmin.f32 %v225_v48, %v177_v31  ;;  %v236_v57 = vsub.f32 %v225_v48, %v222_v33  ;;  %v363_v42 = vld [vmem:[%s553_s0 + $0x48] sm:$0xff] }
   0xe   :  { %v197_v51 = vmax.f32 %v196_v43, 0.0  ;;  %v201_v54 = vmax.f32 %v200_v47, 0.0  ;;  %v231_v56 = vmin.f32 %v226_v49, %v178_v35  ;;  %v237_v59 = vsub.f32 %v226_v49, %v224_v46 }
   0xf   :  { %v209_v58 = vadd.f32 %v208_v52, %v205_v44  ;;  %v229_v61 = vsub.f32 %v227_v55, %v228_v50  ;;  %v140_v46 = vsub.f32 %v347_v36, %v398_v0  ;;  %v145_v50 = vsub.f32 %v352_v37, %v363_v42 }
  0x10   :  { %v202_v60 = vmul.f32 %v201_v54, %v197_v51  ;;  %v233_v62 = vsub.f32 %v231_v56, %v232_v53  ;;  %v238_v63 = vmul.f32 %v237_v59, %v236_v57 }
  0x11   :  { %v230_v6 = vmax.f32 %v229_v61, 0.0  ;;  %v146_v55 = vmul.f32 %v140_v46, %v140_v46  ;;  %v147_v56 = vmul.f32 %v145_v50, %v145_v50 }
  0x12   :  { %v210_v5 = vsub.f32 %v209_v58, %v202_v60  ;;  %v234_v9 = vmax.f32 %v233_v62, 0.0  ;;  %v239_v10 = vadd.f32 %v238_v63, %v208_v52 }
  0x13   :  { %v148_v59 = vadd.f32 %v147_v56, %v146_v55 }
  0x14   :  { %v235_v11 = vmul.f32 %v234_v9, %v230_v6 }
  0x15   :  { %v149_v61 = vsel %vm137_vm0, %v148_v59, 0.0 }
  0x16   :  { %v240_v14 = vsub.f32 %v239_v10, %v235_v11  ;;  %v241_v15 = vmul.f32 %v235_v11, %v210_v5 }
  0x18   :  { %v242_v19 = vmul.f32 %v240_v14, %v202_v60 }
  0x1a   :  { %vm487_vm1 = vcmp.gt.f32.partialorder %v241_v15, %v242_v19 }
  0x1b   :  { %v245_v26 = vsel %vm487_vm1, %v240_v14, %v210_v5  ;;  %v248_v27 = vsel %vm487_vm1, %v426_v7, %v403_v1  ;;  %v249_v28 = vsel %vm487_vm1, %v451_v16, %v408_v2  ;;  %v250_v29 = vsel %vm487_vm1, %v431_v8, %v414_v3 }
  0x1c   :  { %375 = vrcp.f32 %v245_v26  ;;  %v251_v30 = vsel %vm487_vm1, %v468_v23, %v419_v4  ;;  %v255_v1 = vsel %vm487_vm1, %v359_v20, %v439_v12  ;;  %v258_v7 = vsel %vm487_vm1, %v360_v21, %v444_v13  ;;  %v353_v12 = vld [vmem:[%s554_s1 + $0x50] sm:$0xff]  ;;  %v354_v13 = vld [vmem:[%s554_s1 + $0x58] sm:$0xff] }
  0x1d   :  { %v261_v2 = vsel %vm487_vm1, %v361_v22, %v456_v17  ;;  %v264_v3 = vsel %vm487_vm1, %v362_v24, %v461_v18  ;;  %v266_v8 = vsub.f32 %v248_v27, %v255_v1  ;;  %v267_v16 = vsub.f32 %v249_v28, %v258_v7  ;;  %v364_v17 = vld [vmem:[%s553_s0 + $0x50] sm:$0xff]  ;;  %v365_v18 = vld [vmem:[%s553_s0 + $0x58] sm:$0xff] }
  0x1e   :  { %v268_v31 = vsub.f32 %v250_v29, %v261_v2  ;;  %v269_v4 = vsub.f32 %v251_v30, %v264_v3  ;;  %v154_v38 = vsub.f32 %v353_v12, %v364_v17  ;;  %v161_v39 = vsub.f32 %v354_v13, %v365_v18 }
  0x1f   :  { %v270_v23 = vmul.f32 %v266_v8, %v266_v8  ;;  %v271_v32 = vmul.f32 %v267_v16, %v267_v16  ;;  %v244_v40 = vsel %vm487_vm1, %v235_v11, %v202_v60  ;;  %v252_v44 = vsel %vm487_vm1, %v352_v37, %v347_v36 }
  0x20   :  { %v273_v33 = vmul.f32 %v268_v31, %v268_v31  ;;  %v275_v35 = vmul.f32 %v269_v4, %v269_v4  ;;  %v155_v47 = vmul.f32 %v154_v38, %v154_v38  ;;  %v162_v48 = vmul.f32 %v161_v39, %v161_v39 }
  0x21   :  { %v272_v34 = vadd.f32 %v271_v32, %v270_v23 }
  0x22   :  { %v163_v53 = vadd.f32 %v162_v48, %v155_v47 }
  0x23   :  { %v274_v41 = vadd.f32 %v273_v33, %v272_v34 }
  0x25   :  { %v276_v45 = vadd.f32 %v275_v35, %v274_v41 }
  0x26   :  { %v376_v43 = vpop.eup %375 }
  0x27   :  { %v247_v49 = vmul.f32 %v376_v43, %v244_v40  ;;  %v278_v52 = vmul.f32 5.0, %v276_v45 }
  0x29   :  { %v265_v51 = vsub.f32 %v252_v44, %v247_v49 }
  0x2b   :  { %v277_v54 = vmul.f32 %v265_v51, %v265_v51 }
  0x2d   :  { %v279_v57 = vadd.f32 %v278_v52, %v277_v54 }
  0x2f   :  { %v280_v58 = vadd.f32 %v279_v57, %v163_v53 }
  0x31   :  { %v281_v60 = vsel %vm136_vm2, %v280_v58, 0.0 }
  0x32   :  { %299 = vadd.xlane.f32.xlu0 %v281_v60 }
  0x36   :  { %310 = vadd.xlane.f32.xlu0 %v149_v61 }
  0x91   :  { %v322_v62 = vpop.xlane.xlu1 %321 }
  0x92   :  { %v323_v63 = vrot.slane %v322_v62, 4 }
  0x94   :  { %v324_v5 = vadd.f32 %v323_v63, %v322_v62 }
  0x96   :  { %v325_v11 = vrot.slane %v324_v5, 2 }
  0x98   :  { %v326_v22 = vadd.f32 %v325_v11, %v324_v5 }
  0x9a   :  { %v327_v0 = vrot.slane %v326_v22, 1 }
  0x9c   :  { %v328_v30 = vadd.f32 %v327_v0, %v326_v22 }
  0xbf   :  { %v300_v6 = vpop.xlane.xlu0 %299 }
  0xc0   :  { %v301_v9 = vrot.slane %v300_v6, 4 }
  0xc2   :  { %v302_v10 = vadd.f32 %v301_v9, %v300_v6 }
  0xc3   :  { %v311_v14 = vpop.xlane.xlu0 %310 }
  0xc4   :  { %v303_v15 = vrot.slane %v302_v10, 2  ;;  %v312_v19 = vrot.slane %v311_v14, 4 }
  0xc6   :  { %v313_v20 = vadd.f32 %v312_v19, %v311_v14  ;;  %v304_v21 = vadd.f32 %v303_v15, %v302_v10 }
  0xc8   :  { %v314_v24 = vrot.slane %v313_v20, 2  ;;  %v305_v25 = vrot.slane %v304_v21, 1 }
  0xca   :  { %v315_v26 = vadd.f32 %v314_v24, %v313_v20  ;;  %v306_v27 = vadd.f32 %v305_v25, %v304_v21 }
  0xcc   :  { %368 = vpush %v306_v27  ;;  %v316_v28 = vrot.slane %v315_v26, 1 }
  0xce   :  { %v317_v29 = vadd.f32 %v316_v28, %v315_v26 }
  0xd0   :  { %370 = vpush %v317_v29 }
  0xd1   :  { %372 = vpush %v328_v30 }
  0xfd   :  { %s369_s0 = spop %368 }
  0xfe   :  { %v308_v12 = vstv %s369_s0 }
 0x101   :  { %s371_s1 = spop %370 }
 0x102   :  { %s373_s29 = spop %372  ;;  %v319_v16 = vstv %s371_s1 }
 0x103   :  { %v330_v1 = vstv %s373_s29 }
 0x104   :  { %v367_v7 = vadd.f32 -926.0, %v330_v1 }
 0x106   :  { %v332_v2 = vmul.f32 2.0, %v367_v7 }
 0x108   :  { %v333_v3 = vmax.f32 %v332_v2, 1.0 }
 0x10a   :  { %377 = vrcp.f32 %v333_v3 }
 0x114   :  { %v378_v8 = vpop.eup %377 }
 0x115   :  { %v335_v31 = vmul.f32 %v378_v8, %v319_v16 }
 0x117   :  { %v336_v4 = vmul.f32 0.1, %v335_v31 }
 0x119   :  { %v337_v13 = vadd.f32 %v336_v4, %v308_v12 }
 0x11b   :  { %v338_v17 = vmul.f32 0.5, %v337_v13 }
 0x11d   :  { %339 = vst [vmem:[%s555_s2] sm:$0xff] %v338_v17 }

</bundles_post_ra>
